<compile_context>
chip_gen: v6e
topology: v6e:2x2x1
jax: 0.10.0
libtpu: 0.0.40
codegen_flags: <defaults>
</compile_context>

<pallas_src>
import functools

import jax
import jax.numpy as jnp
from jax.experimental import pallas as pl
from jax.experimental.pallas import tpu as pltpu

ALPHA = 0.01
GAMMA = 2              # baked in as an explicit square below
LANE = 128
SUBLANE = 8


def _focal_loss_kernel(x_ref, t_ref, out_ref, *, tile_rows, tiles_per_part,
                       valid_rows, need_mask, soft_targets):
    # x_ref, t_ref: (tile_rows, 128) tiles (native dtype) in VMEM.
    # out_ref: (1, acc_rows, 128) f32 partial-sum block, resident across the
    #          sequential (j) grid axis -> it is the accumulator.
    i = pl.program_id(0)   # parallel part (TensorCore split on v7x)
    j = pl.program_id(1)   # sequential row-tile within this part

    @pl.when(j == 0)
    def _init():
        out_ref[...] = jnp.zeros_like(out_ref)

    p = x_ref[...].astype(jnp.float32)
    t = t_ref[...].astype(jnp.float32)

    if soft_targets:
        # General path (matches PyTorch BCE exactly for arbitrary targets).
        log_p = jnp.maximum(jnp.log(p), -100.0)
        log_1mp = jnp.maximum(jnp.log(1.0 - p), -100.0)
        bce = -(t * log_p + (1.0 - t) * log_1mp)
        one_minus_pt = 1.0 - jnp.exp(-bce)
    else:
        # Hard {0,1} targets: pt = p if t==1 else 1-p.  One log per element
        # instead of 2 logs + 1 exp; mathematically identical to the PyTorch
        # formulation for binary labels (up to the <exp(-100) clamp corner).
        pt = jnp.where(t > 0.5, p, 1.0 - p)
        bce = -jnp.maximum(jnp.log(pt), -100.0)
        one_minus_pt = 1.0 - pt

    # gamma == 2 as an explicit square; ALPHA is applied once in the wrapper.
    contrib = (one_minus_pt * one_minus_pt) * bce

    def accumulate(vals):
        if tile_rows % SUBLANE == 0:
            # Fold groups of 8 rows together: pure vreg-wise VPU adds, no XLU.
            vals = jnp.sum(
                vals.reshape(tile_rows // SUBLANE, SUBLANE, LANE), axis=0)
        out_ref[0] += vals

    if need_mask:
        # Only the globally-last tile holds overhang rows; every other tile
        # accumulates unmasked (no iota / compare / select on the hot path).
        is_last = jnp.logical_and(i == pl.num_programs(0) - 1,
                                  j == pl.num_programs(1) - 1)

        @pl.when(jnp.logical_not(is_last))
        def _full():
            accumulate(contrib)

        @pl.when(is_last)
        def _masked():
            row = jax.lax.broadcasted_iota(jnp.int32, (tile_rows, LANE), 0)
            global_row = (i * tiles_per_part + j) * tile_rows + row
            accumulate(jnp.where(global_row < valid_rows, contrib, 0.0))
    else:
        accumulate(contrib)


def _elementwise_focal(p, t, soft_targets):
    """(1 - pt)^2 * BCE in f32 (ALPHA not applied) — used for the tiny
    ragged tail and the sub-128-element fallback."""
    p = p.astype(jnp.float32)
    t = t.astype(jnp.float32)
    if soft_targets:
        bce = -(t * jnp.maximum(jnp.log(p), -100.0)
                + (1.0 - t) * jnp.maximum(jnp.log(1.0 - p), -100.0))
        one_minus_pt = 1.0 - jnp.exp(-bce)
    else:
        pt = jnp.where(t > 0.5, p, 1.0 - p)
        bce = -jnp.maximum(jnp.log(pt), -100.0)
        one_minus_pt = 1.0 - pt
    return (one_minus_pt * one_minus_pt) * bce


def _device_kind():
    try:
        return jax.devices()[0].device_kind.lower()
    except Exception:
        return ""


@functools.partial(jax.jit, static_argnames=("soft_targets",))
def focal_loss(inputs, targets, soft_targets=False):
    """inputs: probabilities in [0, 1] (module default logits=False).
    targets: same shape; any dtype (bool/int8/bf16/f32) — upcast in-kernel.
    soft_targets=False assumes hard {0,1} labels (1 transcendental/elem);
    set True for soft / label-smoothed targets (exact PyTorch BCE path)."""
    assert inputs.shape == targets.shape
    n_true = inputs.size

    x = inputs.reshape(-1)     # free reshape; native dtype stays in HBM
    t = targets.reshape(-1)

    rows = n_true // LANE
    rem = n_true - rows * LANE

    tail = jnp.float32(0.0)
    if rem:
        # Rare ragged tail (< 128 elements): plain JAX, instead of padding
        # BOTH big arrays in HBM (an extra full read+write pass).
        tail = jnp.sum(
            _elementwise_focal(x[rows * LANE:], t[rows * LANE:], soft_targets))

    if rows == 0:
        # Fewer than 128 elements total: no kernel needed.
        return (ALPHA * tail) / n_true

    if rem:
        # TODO(synk): XLA still materializes this prefix slice as one copy; a
        # fully copy-free ragged path would need 1-D manual-DMA blocking.
        x2 = jax.lax.slice(x, (0,), (rows * LANE,)).reshape(rows, LANE)
        t2 = jax.lax.slice(t, (0,), (rows * LANE,)).reshape(rows, LANE)
    else:
        x2 = x.reshape(rows, LANE)   # free reshape
        t2 = t.reshape(rows, LANE)

    kind = _device_kind()
    is_v5e = ("v5 lite" in kind) or ("v5e" in kind) or ("v5litepod" in kind)
    multi_tc = ("v7" in kind) or ("7x" in kind)   # v7x: 2 TensorCores / chip

    # --- Tile sizing (generation aware) --------------------------------------
    # Budget for the double-buffered input tiles: 8 MiB on v5e, 16 MiB on
    # v6e/v7x (f32+f32 -> 4096 / 8192 rows per tile).  Fewer, bigger grid
    # steps amortize the ~0.35 us per-step overhead.
    bytes_per_row = LANE * (x2.dtype.itemsize + t2.dtype.itemsize)
    budget = (8 << 20) if is_v5e else (16 << 20)
    max_tile_rows = max(SUBLANE,
                        (budget // (2 * bytes_per_row)) // SUBLANE * SUBLANE)
    tile_rows = rows if rows <= max_tile_rows else max_tile_rows
    n_tiles = pl.cdiv(rows, tile_rows)

    # --- 2-TensorCore split (v7x only) ---------------------------------------
    num_parts = 1
    if multi_tc and n_tiles >= 2:
        if n_tiles % 2:
            # Shave the tile so the tile count comes out even; since the grid
            # still covers exactly cdiv(rows, tile_rows) tiles, no block index
            # ever points past the array (overhang lives only in the global
            # last tile, which the in-kernel mask handles).
            cand = ((pl.cdiv(rows, n_tiles + 1) + SUBLANE - 1)
                    // SUBLANE) * SUBLANE
            if cand >= SUBLANE and pl.cdiv(rows, cand) % 2 == 0:
                tile_rows = cand
                n_tiles = pl.cdiv(rows, cand)
        if n_tiles % 2 == 0:
            num_parts = 2
    tiles_per_part = n_tiles // num_parts

    need_mask = n_tiles * tile_rows != rows
    acc_rows = SUBLANE if tile_rows % SUBLANE == 0 else tile_rows

    kernel = functools.partial(
        _focal_loss_kernel,
        tile_rows=tile_rows,
        tiles_per_part=tiles_per_part,
        valid_rows=rows,
        need_mask=need_mask,
        soft_targets=soft_targets,
    )

    in_tile_bytes = tile_rows * bytes_per_row
    # Explicit scoped-VMEM budget: double-buffered inputs + headroom; fits the
    # physical VMEM of v5e/v6e (128 MiB) and v7x (64 MiB) comfortably.
    vmem_limit = min(48 << 20, max(16 << 20, 2 * in_tile_bytes + (4 << 20)))

    if num_parts == 2:
        # Only taken on detected multi-TC (v7x) chips.
        part_sem = getattr(pltpu, "CORE_PARALLEL", pltpu.PARALLEL)
        dim_sem = (part_sem, pltpu.ARBITRARY)
    else:
        dim_sem = ("parallel", "arbitrary")

    n_main = rows * LANE
    cost = pl.CostEstimate(
        flops=8 * n_main,
        transcendentals=(3 if soft_targets else 1) * n_main,
        bytes_accessed=rows * bytes_per_row + num_parts * acc_rows * LANE * 4,
    )

    partials = pl.pallas_call(
        kernel,
        out_shape=jax.ShapeDtypeStruct((num_parts, acc_rows, LANE), jnp.float32),
        grid=(num_parts, tiles_per_part),
        in_specs=[
            pl.BlockSpec((tile_rows, LANE),
                         lambda i, j: (i * tiles_per_part + j, 0)),
            pl.BlockSpec((tile_rows, LANE),
                         lambda i, j: (i * tiles_per_part + j, 0)),
        ],
        out_specs=pl.BlockSpec((1, acc_rows, LANE), lambda i, j: (i, 0, 0)),
        compiler_params=pltpu.CompilerParams(
            dimension_semantics=dim_sem,
            vmem_limit_bytes=vmem_limit),
        cost_estimate=cost,
    )(x2, t2)

    # reduce=True -> mean over the ORIGINAL element count; ALPHA applied once.
    total = jnp.sum(partials) + tail
    return (ALPHA * total) / n_true


def focal_loss_ref(inputs, targets):
    """Pure-JAX reference matching PyTorch FocalLoss defaults."""
    p = inputs.astype(jnp.float32)
    t = targets.astype(jnp.float32)
    bce = -(t * jnp.maximum(jnp.log(p), -100.0)
            + (1.0 - t) * jnp.maximum(jnp.log(1.0 - p), -100.0))
    pt = jnp.exp(-bce)
    f = ALPHA * (1.0 - pt) ** GAMMA * bce
    return jnp.mean(f)


if __name__ == "__main__":
    key = jax.random.PRNGKey(0)
    k1, k2 = jax.random.split(key)

    # Module default is logits=False, so inputs are probabilities in (0, 1)
    # (e.g. sigmoid outputs of a binary classifier), targets are 0/1 labels.
    # Shapes consistent with a small conv-net output: (N, C, H, W).
    shape = (2, 4, 16, 16)
    inputs = jax.nn.sigmoid(jax.random.normal(k1, shape, dtype=jnp.float32))
    targets = jax.random.bernoulli(k2, p=0.5, shape=shape).astype(jnp.float32)

    ref = focal_loss_ref(inputs, targets)

    # Fast path: hard {0,1} targets (1 transcendental / element).
    out = focal_loss(inputs, targets)
    jax.block_until_ready(out)
    assert jnp.allclose(out, ref, rtol=1e-4, atol=1e-7), (out, ref)

    # General path: exact PyTorch BCE formulation (soft targets allowed).
    out_soft = focal_loss(inputs, targets, soft_targets=True)
    jax.block_until_ready(out_soft)
    assert jnp.allclose(out_soft, ref, rtol=1e-4, atol=1e-7), (out_soft, ref)

    print("KERNEL_OK")
</pallas_src>

<mosaic_0001>
module attributes {stable_mosaic.version = 11 : i64} {
  func.func @_focal_loss_kernel(%arg0: i32, %arg1: i32, %arg2: memref<16x128xf32, #tpu.memory_space<vmem>>, %arg3: memref<16x128xf32, #tpu.memory_space<vmem>>, %arg4: memref<1x8x128xf32, #tpu.memory_space<vmem>>) attributes {dimension_semantics = [#tpu.dimension_semantics<parallel>, #tpu.dimension_semantics<arbitrary>], iteration_bounds = array<i64: 1, 1>, scalar_prefetch = 0 : i64, scratch_operands = 0 : i64, tpu.core_type = #tpu.core_type<tc>, window_params = [{transform_indices = @transform_0, window_bounds = array<i64: 16, 128>}, {transform_indices = @transform_1, window_bounds = array<i64: 16, 128>}, {transform_indices = @transform_2, window_bounds = array<i64: 1, 8, 128>}]} {
    %c0_i32 = arith.constant 0 : i32
    %0 = arith.cmpi eq, %arg1, %c0_i32 : i32
    %1 = arith.extui %0 : i1 to i32
    %c0_i32_0 = arith.constant 0 : i32
    %2 = arith.cmpi ne, %1, %c0_i32_0 : i32
    scf.if %2 {
      %cst_15 = arith.constant 0.000000e+00 : f32
      %27 = vector.broadcast %cst_15 : f32 to vector<1x8x128xf32>
      %c0_16 = arith.constant 0 : index
      %c0_17 = arith.constant 0 : index
      %c0_18 = arith.constant 0 : index
      %28 = vector.load %arg4[%c0_16, %c0_17, %c0_18] : memref<1x8x128xf32, #tpu.memory_space<vmem>>, vector<1x8x128xf32>
      tpu.vector_store %arg4[%c0_16, %c0_17, %c0_18], %27 {strides = array<i32>} : memref<1x8x128xf32, #tpu.memory_space<vmem>>, vector<1x8x128xf32>,
    } else {
    }
    %c0 = arith.constant 0 : index
    %c0_1 = arith.constant 0 : index
    %3 = vector.load %arg2[%c0, %c0_1] : memref<16x128xf32, #tpu.memory_space<vmem>>, vector<16x128xf32>
    %c0_2 = arith.constant 0 : index
    %c0_3 = arith.constant 0 : index
    %4 = vector.load %arg3[%c0_2, %c0_3] : memref<16x128xf32, #tpu.memory_space<vmem>>, vector<16x128xf32>
    %cst = arith.constant 5.000000e-01 : f32
    %5 = vector.broadcast %cst : f32 to vector<16x128xf32>
    %6 = arith.cmpf ogt, %4, %5 : vector<16x128xf32>
    %cst_4 = arith.constant 1.000000e+00 : f32
    %7 = vector.broadcast %cst_4 : f32 to vector<16x128xf32>
    %8 = arith.subf %7, %3 : vector<16x128xf32>
    %9 = arith.select %6, %3, %8 : vector<16x128xi1>, vector<16x128xf32>
    %10 = math.log %9 : vector<16x128xf32>
    %cst_5 = arith.constant -1.000000e+02 : f32
    %11 = vector.broadcast %cst_5 : f32 to vector<16x128xf32>
    %12 = arith.maximumf %10, %11 : vector<16x128xf32>
    %cst_6 = arith.constant 0.000000e+00 : f32
    %13 = vector.broadcast %cst_6 : f32 to vector<16x128xf32>
    %14 = arith.subf %13, %12 : vector<16x128xf32>
    %cst_7 = arith.constant 1.000000e+00 : f32
    %15 = vector.broadcast %cst_7 : f32 to vector<16x128xf32>
    %16 = arith.subf %15, %9 : vector<16x128xf32>
    %17 = arith.mulf %16, %16 : vector<16x128xf32>
    %18 = arith.mulf %17, %14 : vector<16x128xf32>
    %19 = vector.shape_cast %18 : vector<16x128xf32> to vector<2x8x128xf32>
    %cst_8 = arith.constant dense<0.000000e+00> : vector<8x128xf32>
    %20 = vector.multi_reduction <add>, %19, %cst_8 [0] : vector<2x8x128xf32> to vector<8x128xf32>
    %c0_9 = arith.constant 0 : index
    %c0_10 = arith.constant 0 : index
    %c0_11 = arith.constant 0 : index
    %21 = vector.load %arg4[%c0_9, %c0_10, %c0_11] : memref<1x8x128xf32, #tpu.memory_space<vmem>>, vector<1x8x128xf32>
    %22 = vector.shape_cast %21 : vector<1x8x128xf32> to vector<8x128xf32>
    %23 = arith.addf %22, %20 : vector<8x128xf32>
    %c0_12 = arith.constant 0 : index
    %c0_13 = arith.constant 0 : index
    %c0_14 = arith.constant 0 : index
    %24 = vector.load %arg4[%c0_12, %c0_13, %c0_14] : memref<1x8x128xf32, #tpu.memory_space<vmem>>, vector<1x8x128xf32>
    %25 = vector.shape_cast %24 : vector<1x8x128xf32> to vector<8x128xf32>
    %26 = vector.shape_cast %23 : vector<8x128xf32> to vector<1x8x128xf32>
    tpu.vector_store %arg4[%c0_12, %c0_13, %c0_14], %26 {strides = array<i32>} : memref<1x8x128xf32, #tpu.memory_space<vmem>>, vector<1x8x128xf32>,
    return
  }
  func.func @transform_0(%arg0: i32, %arg1: i32) -> (i32, i32) {
    %c1_i32 = arith.constant 1 : i32
    %0 = arith.muli %arg0, %c1_i32 : i32
    %1 = arith.addi %0, %arg1 : i32
    %c0_i32 = arith.constant 0 : i32
    %c0_i32_0 = arith.constant 0 : i32
    return %1, %c0_i32 : i32, i32
  }
  func.func @transform_1(%arg0: i32, %arg1: i32) -> (i32, i32) {
    %c1_i32 = arith.constant 1 : i32
    %0 = arith.muli %arg0, %c1_i32 : i32
    %1 = arith.addi %0, %arg1 : i32
    %c0_i32 = arith.constant 0 : i32
    %c0_i32_0 = arith.constant 0 : i32
    return %1, %c0_i32 : i32, i32
  }
  func.func @transform_2(%arg0: i32, %arg1: i32) -> (i32, i32, i32) {
    %c0_i32 = arith.constant 0 : i32
    %c0_i32_0 = arith.constant 0 : i32
    %c0_i32_1 = arith.constant 0 : i32
    return %arg0, %c0_i32, %c0_i32_0 : i32, i32, i32
  }
}

</mosaic_0001>

<bundles_post_ra>
// kernel: focal_loss.1
= control target key start
LH: loop header
LB: loop body
LE: loop exit
PB: predicated region body
PF: predicated region fallthrough
CT: control target
= control target key end

     0   :  { %s139_s0 = inlined_call_operand.vmem [shape: f32[16,128], index: 0, kind: input, shape index: {}]   ;;  %s140_s1 = inlined_call_operand.vmem [shape: f32[16,128], index: 1, kind: input, shape index: {}]   ;;  %s141_s2 = inlined_call_operand.vmem [shape: f32[1,8,128], index: 2, kind: output, shape index: {}]  }
   0x1   :  { %v60_v0 = vld [vmem:[%s139_s0] sm:$0xff]  ;;  %v61_v1 = vld [vmem:[%s139_s0 + $0x8] sm:$0xff] }
   0x2   :  { %v62_v2 = vld [vmem:[%s140_s1] sm:$0xff]  ;;  %v63_v3 = vld [vmem:[%s140_s1 + $0x8] sm:$0xff]  ;;  %v66_v4 = vsub.f32 1.0, %v60_v0  ;;  %v67_v5 = vsub.f32 1.0, %v61_v1 }
   0x3   :  { %vm64_vm0 = vcmp.gt.f32.partialorder %v62_v2, 0.5  ;;  %vm65_vm1 = vcmp.gt.f32.partialorder %v63_v3, 0.5 }
   0x4   :  { %v68_v6 = vsel %vm64_vm0, %v60_v0, %v66_v4  ;;  %v69_v7 = vsel %vm65_vm1, %v61_v1, %v67_v5 }
   0x5   :  { %105 = vlog2.f32 %v68_v6  ;;  %v78_v8 = vsub.f32 1.0, %v68_v6  ;;  %v79_v10 = vsub.f32 1.0, %v69_v7 }
   0x6   :  { %107 = vlog2.f32 %v69_v7 }
   0x7   :  { %v80_v15 = vmul.f32 %v78_v8, %v78_v8  ;;  %v81_v17 = vmul.f32 %v79_v10, %v79_v10 }
  0x12   :  { %v106_v9 = vpop.eup %105 }
  0x13   :  { %v108_v11 = vpop.eup %107  ;;  %v71_v12 = vmul.f32 0.6931472, %v106_v9 }
  0x14   :  { %v73_v13 = vmul.f32 0.6931472, %v108_v11 }
  0x15   :  { %v74_v14 = vmax.f32 %v71_v12, -100.0 }
  0x16   :  { %v75_v16 = vmax.f32 %v73_v13, -100.0 }
  0x17   :  { %v76_v18 = vsub.f32 0.0, %v74_v14 }
  0x18   :  { %v77_v19 = vsub.f32 0.0, %v75_v16 }
  0x19   :  { %v82_v20 = vmul.f32 %v80_v15, %v76_v18 }
  0x1a   :  { %v83_v21 = vmul.f32 %v81_v17, %v77_v19 }
  0x1c   :  { %v84_v22 = vadd.f32 %v83_v21, %v82_v20 }
  0x1e   :  { %87 = vst [vmem:[%s141_s2] sm:$0xff] %v84_v22 }

</bundles_post_ra>
